<compile_context>
chip_gen: v7x
topology: tpu7x:2x2x1
jax: 0.10.0
libtpu: 0.0.40
codegen_flags: <defaults>
</compile_context>

<pallas_src>
import functools

import jax
import jax.numpy as jnp
from jax.experimental import pallas as pl
from jax.experimental.pallas import tpu as pltpu


# ----------------------------------------------------------------------------
# Kernel 1: complex mode mixing   out[b,o,m] = sum_i x_ft[b,i,m] * w[i,o,m]
# Layout: modes flattened on the last (lane) axis; VPU multiply + sublane-reduce
# (channel counts are tiny, so no MXU).  One grid step per batch element.
# ----------------------------------------------------------------------------
def _spectral_mix_kernel(xr_ref, xi_ref, wr_ref, wi_ref, outr_ref, outi_ref):
    # Blocks: xr/xi (1, Cin, M); wr/wi (Cout, Cin, M) [resident]; out (1, Cout, M).
    xr = xr_ref[0]                    # (Cin, M)
    xi = xi_ref[0]                    # (Cin, M)
    cout = wr_ref.shape[0]
    rows_r, rows_i = [], []
    for o in range(cout):             # static unroll: Cout is small
        wr_o = wr_ref[o]              # (Cin, M)  leading-axis index, layout-trivial
        wi_o = wi_ref[o]              # (Cin, M)
        # complex product, reduced over input channels (sublane axis -> XLU)
        rows_r.append(jnp.sum(xr * wr_o - xi * wi_o, axis=0, keepdims=True))
        rows_i.append(jnp.sum(xr * wi_o + xi * wr_o, axis=0, keepdims=True))
    outr_ref[0] = jnp.concatenate(rows_r, axis=0)    # (Cout, M), single dense store
    outi_ref[0] = jnp.concatenate(rows_i, axis=0)


def spectral_mix(xr, xi, wr, wi):
    """xr/xi: (B, Cin, M) f32;  wr/wi: (Cout, Cin, M) f32  ->  (B, Cout, M) x2."""
    B, Cin, M = xr.shape
    Cout = wr.shape[0]
    x_spec = pl.BlockSpec((1, Cin, M), lambda b: (b, 0, 0))
    w_spec = pl.BlockSpec((Cout, Cin, M), lambda b: (0, 0, 0))   # resident weights
    o_spec = pl.BlockSpec((1, Cout, M), lambda b: (b, 0, 0))
    out_shape = (
        jax.ShapeDtypeStruct((B, Cout, M), jnp.float32),
        jax.ShapeDtypeStruct((B, Cout, M), jnp.float32),
    )
    return pl.pallas_call(
        _spectral_mix_kernel,
        out_shape=out_shape,
        grid_spec=pltpu.PrefetchScalarGridSpec(
            num_scalar_prefetch=0,
            grid=(B,),
            in_specs=[x_spec, x_spec, w_spec, w_spec],
            out_specs=[o_spec, o_spec],
        ),
        compiler_params=pltpu.CompilerParams(
            dimension_semantics=("parallel",)),
    )(xr, xi, wr, wi)


# ----------------------------------------------------------------------------
# Kernel 2: 1x1 conv (+bias, folded into the matmul) + residual add
# x_aug: (Cin+1, N) with a trailing ones-row; w_aug: (Cout, Cin+1) with the
# bias as last column.  N = B*H*W is the lane axis, tiled in 128-multiples.
# ----------------------------------------------------------------------------
def _pointwise_add_kernel(w_ref, x_ref, x1_ref, o_ref):
    w = w_ref[...]                                            # (Cout, Cin+1)
    x = x_ref[...]                                            # (Cin+1, Nt)
    conv = jnp.dot(w, x, preferred_element_type=jnp.float32)  # (Cout, Nt) = conv + bias
    o_ref[...] = conv + x1_ref[...]                           # add spectral branch


def pointwise_conv_add(w_aug, x_aug, x1_2d):
    """w_aug: (Cout, Cin+1); x_aug: (Cin+1, N); x1_2d: (Cout, N) -> (Cout, N)."""
    K, N = x_aug.shape
    Cout = w_aug.shape[0]
    # Column tiling: >=2 tiles keeps both v7x TensorCores busy; tiles stay
    # multiples of 128 lanes.  At production sizes the 16K-column cap keeps
    # double-buffered blocks comfortably inside VMEM (re-derive for v7x 64 MiB).
    if N % 256 == 0:
        nt = N // 2
        while nt > 16384 and nt % 256 == 0:
            nt //= 2
        n_tiles = N // nt
    else:
        n_tiles, nt = 1, N
    return pl.pallas_call(
        _pointwise_add_kernel,
        out_shape=jax.ShapeDtypeStruct((Cout, N), jnp.float32),
        grid_spec=pltpu.PrefetchScalarGridSpec(
            num_scalar_prefetch=0,
            grid=(n_tiles,),
            in_specs=[
                pl.BlockSpec((Cout, K), lambda j: (0, 0)),     # resident weight+bias
                pl.BlockSpec((K, nt), lambda j: (0, j)),
                pl.BlockSpec((Cout, nt), lambda j: (0, j)),
            ],
            out_specs=pl.BlockSpec((Cout, nt), lambda j: (0, j)),
        ),
        compiler_params=pltpu.CompilerParams(
            dimension_semantics=("parallel",)),
    )(w_aug, x_aug, x1_2d)


# ----------------------------------------------------------------------------
# Block forward (NCHW), mirroring the PyTorch module
# ----------------------------------------------------------------------------
@functools.partial(jax.jit, static_argnames=("modes1", "modes2"))
def block_forward(x, w1r, w1i, w2r, w2i, ws_w, ws_b, *, modes1, modes2):
    B, Cin, H, W = x.shape
    Cout = ws_w.shape[0]
    m1, m2 = modes1, modes2
    M = 2 * m1 * m2

    # --- spectral branch ---
    # TODO(synk): FFT/iFFT have no Pallas TPU primitive; computed with jnp.fft.
    x_ft = jnp.fft.rfft2(x.astype(jnp.float32), axes=(-2, -1))   # (B,Cin,H,W//2+1) c64

    lo = x_ft[:, :, :m1, :m2]               # (B, Cin, m1, m2)
    hi = x_ft[:, :, H - m1:, :m2]           # (B, Cin, m1, m2)
    xs = jnp.concatenate([lo, hi], axis=2)  # (B, Cin, 2*m1, m2)
    # Flatten modes onto the last (lane) axis; no transposes of the mode tensor.
    xr = jnp.real(xs).reshape(B, Cin, M)
    xi = jnp.imag(xs).reshape(B, Cin, M)
    # Weights are tiny: reorder once to (Cout, Cin, M) so the kernel indexes the
    # leading axis only.
    wcr = jnp.transpose(jnp.concatenate([w1r, w2r], axis=2), (1, 0, 2, 3)).reshape(Cout, Cin, M)
    wci = jnp.transpose(jnp.concatenate([w1i, w2i], axis=2), (1, 0, 2, 3)).reshape(Cout, Cin, M)

    outr, outi = spectral_mix(xr, xi, wcr, wci)        # (B, Cout, M) x2
    out_modes = (outr + 1j * outi).reshape(B, Cout, 2 * m1, m2)   # c64

    Wf = W // 2 + 1
    out_ft = jnp.zeros((B, Cout, H, Wf), dtype=jnp.complex64)
    out_ft = out_ft.at[:, :, :m1, :m2].set(out_modes[:, :, :m1, :])
    out_ft = out_ft.at[:, :, H - m1:, :m2].set(out_modes[:, :, m1:, :])
    x1 = jnp.fft.irfft2(out_ft, s=(H, W), axes=(-2, -1)).astype(jnp.float32)

    # --- pointwise conv branch + residual add (fused in Pallas) ---
    N = B * H * W
    x2d = jnp.transpose(x.reshape(B, Cin, H * W).astype(jnp.float32),
                        (1, 0, 2)).reshape(Cin, N)
    x_aug = jnp.concatenate([x2d, jnp.ones((1, N), jnp.float32)], axis=0)   # (Cin+1, N)
    w_aug = jnp.concatenate([ws_w.astype(jnp.float32),
                             ws_b.astype(jnp.float32)[:, None]], axis=1)    # (Cout, Cin+1)
    x1_2d = jnp.transpose(x1.reshape(B, Cout, H * W), (1, 0, 2)).reshape(Cout, N)

    out2d = pointwise_conv_add(w_aug, x_aug, x1_2d)                          # (Cout, N)
    out = jnp.transpose(out2d.reshape(Cout, B, H * W), (1, 0, 2)).reshape(B, Cout, H, W)
    return out


# ----------------------------------------------------------------------------
# Pure-JAX reference (for a correctness spot check)
# ----------------------------------------------------------------------------
def block_reference(x, w1r, w1i, w2r, w2i, ws_w, ws_b, *, modes1, modes2):
    B, Cin, H, W = x.shape
    Cout = ws_w.shape[0]
    m1, m2 = modes1, modes2
    x_ft = jnp.fft.rfft2(x.astype(jnp.float32), axes=(-2, -1))
    w1 = w1r + 1j * w1i
    w2 = w2r + 1j * w2i
    out_ft = jnp.zeros((B, Cout, H, W // 2 + 1), dtype=jnp.complex64)
    out_ft = out_ft.at[:, :, :m1, :m2].set(
        jnp.einsum('bixy,ioxy->boxy', x_ft[:, :, :m1, :m2], w1))
    out_ft = out_ft.at[:, :, H - m1:, :m2].set(
        jnp.einsum('bixy,ioxy->boxy', x_ft[:, :, H - m1:, :m2], w2))
    x1 = jnp.fft.irfft2(out_ft, s=(H, W), axes=(-2, -1)).astype(jnp.float32)
    x2 = jnp.einsum('oi,bihw->bohw', ws_w, x) + ws_b[None, :, None, None]
    return x1 + x2


if __name__ == "__main__":
    # Small shapes consistent with the module.
    B, Cin, Cout, H, W = 2, 4, 4, 16, 16
    m1, m2 = 4, 4

    key = jax.random.PRNGKey(0)
    k1, k2, k3, k4, k5, k6, k7 = jax.random.split(key, 7)

    scale = 1.0 / (Cin * Cout)
    # weights1 / weights2: complex, stored as separate real/imag f32 arrays
    w1r = scale * jax.random.uniform(k1, (Cin, Cout, m1, m2), jnp.float32)
    w1i = scale * jax.random.uniform(k2, (Cin, Cout, m1, m2), jnp.float32)
    w2r = scale * jax.random.uniform(k3, (Cin, Cout, m1, m2), jnp.float32)
    w2i = scale * jax.random.uniform(k4, (Cin, Cout, m1, m2), jnp.float32)
    # 1x1 conv weight (Cout, Cin) and bias (Cout,)
    ws_w = jax.random.uniform(k5, (Cout, Cin), jnp.float32, -0.5, 0.5)
    ws_b = jax.random.uniform(k6, (Cout,), jnp.float32, -0.5, 0.5)

    x = jax.random.normal(k7, (B, Cin, H, W), jnp.float32)

    out = block_forward(x, w1r, w1i, w2r, w2i, ws_w, ws_b, modes1=m1, modes2=m2)
    out = jax.block_until_ready(out)

    ref = block_reference(x, w1r, w1i, w2r, w2i, ws_w, ws_b, modes1=m1, modes2=m2)
    ref = jax.block_until_ready(ref)

    assert out.shape == (B, Cout, H, W), out.shape
    assert jnp.max(jnp.abs(out - ref)) < 1e-4, float(jnp.max(jnp.abs(out - ref)))

    print("KERNEL_OK")
</pallas_src>

<mosaic_0001>
module attributes {stable_mosaic.version = 11 : i64} {
  func.func @_spectral_mix_kernel(%arg0: i32, %arg1: memref<1x4x32xf32, #tpu.memory_space<vmem>>, %arg2: memref<1x4x32xf32, #tpu.memory_space<vmem>>, %arg3: memref<4x4x32xf32, #tpu.memory_space<vmem>>, %arg4: memref<4x4x32xf32, #tpu.memory_space<vmem>>, %arg5: memref<1x4x32xf32, #tpu.memory_space<vmem>>, %arg6: memref<1x4x32xf32, #tpu.memory_space<vmem>>) attributes {dimension_semantics = [#tpu.dimension_semantics<parallel>], iteration_bounds = array<i64: 2>, scalar_prefetch = 0 : i64, scratch_operands = 0 : i64, tpu.core_type = #tpu.core_type<tc>, window_params = [{transform_indices = @transform_0, window_bounds = array<i64: 1, 4, 32>}, {transform_indices = @transform_1, window_bounds = array<i64: 1, 4, 32>}, {pipeline_mode = #tpu.pipeline_mode<synchronous>, transform_indices = @transform_2, window_bounds = array<i64: 4, 4, 32>}, {pipeline_mode = #tpu.pipeline_mode<synchronous>, transform_indices = @transform_3, window_bounds = array<i64: 4, 4, 32>}, {transform_indices = @transform_4, window_bounds = array<i64: 1, 4, 32>}, {transform_indices = @transform_5, window_bounds = array<i64: 1, 4, 32>}]} {
    %c0 = arith.constant 0 : index
    %c0_0 = arith.constant 0 : index
    %c0_1 = arith.constant 0 : index
    %0 = vector.load %arg1[%c0, %c0_0, %c0_1] : memref<1x4x32xf32, #tpu.memory_space<vmem>>, vector<1x4x32xf32>
    %1 = vector.shape_cast %0 : vector<1x4x32xf32> to vector<4x32xf32>
    %c0_2 = arith.constant 0 : index
    %c0_3 = arith.constant 0 : index
    %c0_4 = arith.constant 0 : index
    %2 = vector.load %arg2[%c0_2, %c0_3, %c0_4] : memref<1x4x32xf32, #tpu.memory_space<vmem>>, vector<1x4x32xf32>
    %3 = vector.shape_cast %2 : vector<1x4x32xf32> to vector<4x32xf32>
    %c0_5 = arith.constant 0 : index
    %c0_6 = arith.constant 0 : index
    %c0_7 = arith.constant 0 : index
    %4 = vector.load %arg3[%c0_5, %c0_6, %c0_7] : memref<4x4x32xf32, #tpu.memory_space<vmem>>, vector<1x4x32xf32>
    %5 = vector.shape_cast %4 : vector<1x4x32xf32> to vector<4x32xf32>
    %c0_8 = arith.constant 0 : index
    %c0_9 = arith.constant 0 : index
    %c0_10 = arith.constant 0 : index
    %6 = vector.load %arg4[%c0_8, %c0_9, %c0_10] : memref<4x4x32xf32, #tpu.memory_space<vmem>>, vector<1x4x32xf32>
    %7 = vector.shape_cast %6 : vector<1x4x32xf32> to vector<4x32xf32>
    %8 = arith.mulf %1, %5 : vector<4x32xf32>
    %9 = arith.mulf %3, %7 : vector<4x32xf32>
    %10 = arith.subf %8, %9 : vector<4x32xf32>
    %cst = arith.constant dense<0.000000e+00> : vector<32xf32>
    %11 = vector.multi_reduction <add>, %10, %cst [0] : vector<4x32xf32> to vector<32xf32>
    %12 = vector.shape_cast %11 : vector<32xf32> to vector<1x32xf32>
    %13 = arith.mulf %1, %7 : vector<4x32xf32>
    %14 = arith.mulf %3, %5 : vector<4x32xf32>
    %15 = arith.addf %13, %14 : vector<4x32xf32>
    %cst_11 = arith.constant dense<0.000000e+00> : vector<32xf32>
    %16 = vector.multi_reduction <add>, %15, %cst_11 [0] : vector<4x32xf32> to vector<32xf32>
    %17 = vector.shape_cast %16 : vector<32xf32> to vector<1x32xf32>
    %c1 = arith.constant 1 : index
    %c0_12 = arith.constant 0 : index
    %c0_13 = arith.constant 0 : index
    %18 = vector.load %arg3[%c1, %c0_12, %c0_13] : memref<4x4x32xf32, #tpu.memory_space<vmem>>, vector<1x4x32xf32>
    %19 = vector.shape_cast %18 : vector<1x4x32xf32> to vector<4x32xf32>
    %c1_14 = arith.constant 1 : index
    %c0_15 = arith.constant 0 : index
    %c0_16 = arith.constant 0 : index
    %20 = vector.load %arg4[%c1_14, %c0_15, %c0_16] : memref<4x4x32xf32, #tpu.memory_space<vmem>>, vector<1x4x32xf32>
    %21 = vector.shape_cast %20 : vector<1x4x32xf32> to vector<4x32xf32>
    %22 = arith.mulf %1, %19 : vector<4x32xf32>
    %23 = arith.mulf %3, %21 : vector<4x32xf32>
    %24 = arith.subf %22, %23 : vector<4x32xf32>
    %cst_17 = arith.constant dense<0.000000e+00> : vector<32xf32>
    %25 = vector.multi_reduction <add>, %24, %cst_17 [0] : vector<4x32xf32> to vector<32xf32>
    %26 = vector.shape_cast %25 : vector<32xf32> to vector<1x32xf32>
    %27 = arith.mulf %1, %21 : vector<4x32xf32>
    %28 = arith.mulf %3, %19 : vector<4x32xf32>
    %29 = arith.addf %27, %28 : vector<4x32xf32>
    %cst_18 = arith.constant dense<0.000000e+00> : vector<32xf32>
    %30 = vector.multi_reduction <add>, %29, %cst_18 [0] : vector<4x32xf32> to vector<32xf32>
    %31 = vector.shape_cast %30 : vector<32xf32> to vector<1x32xf32>
    %c2 = arith.constant 2 : index
    %c0_19 = arith.constant 0 : index
    %c0_20 = arith.constant 0 : index
    %32 = vector.load %arg3[%c2, %c0_19, %c0_20] : memref<4x4x32xf32, #tpu.memory_space<vmem>>, vector<1x4x32xf32>
    %33 = vector.shape_cast %32 : vector<1x4x32xf32> to vector<4x32xf32>
    %c2_21 = arith.constant 2 : index
    %c0_22 = arith.constant 0 : index
    %c0_23 = arith.constant 0 : index
    %34 = vector.load %arg4[%c2_21, %c0_22, %c0_23] : memref<4x4x32xf32, #tpu.memory_space<vmem>>, vector<1x4x32xf32>
    %35 = vector.shape_cast %34 : vector<1x4x32xf32> to vector<4x32xf32>
    %36 = arith.mulf %1, %33 : vector<4x32xf32>
    %37 = arith.mulf %3, %35 : vector<4x32xf32>
    %38 = arith.subf %36, %37 : vector<4x32xf32>
    %cst_24 = arith.constant dense<0.000000e+00> : vector<32xf32>
    %39 = vector.multi_reduction <add>, %38, %cst_24 [0] : vector<4x32xf32> to vector<32xf32>
    %40 = vector.shape_cast %39 : vector<32xf32> to vector<1x32xf32>
    %41 = arith.mulf %1, %35 : vector<4x32xf32>
    %42 = arith.mulf %3, %33 : vector<4x32xf32>
    %43 = arith.addf %41, %42 : vector<4x32xf32>
    %cst_25 = arith.constant dense<0.000000e+00> : vector<32xf32>
    %44 = vector.multi_reduction <add>, %43, %cst_25 [0] : vector<4x32xf32> to vector<32xf32>
    %45 = vector.shape_cast %44 : vector<32xf32> to vector<1x32xf32>
    %c3 = arith.constant 3 : index
    %c0_26 = arith.constant 0 : index
    %c0_27 = arith.constant 0 : index
    %46 = vector.load %arg3[%c3, %c0_26, %c0_27] : memref<4x4x32xf32, #tpu.memory_space<vmem>>, vector<1x4x32xf32>
    %47 = vector.shape_cast %46 : vector<1x4x32xf32> to vector<4x32xf32>
    %c3_28 = arith.constant 3 : index
    %c0_29 = arith.constant 0 : index
    %c0_30 = arith.constant 0 : index
    %48 = vector.load %arg4[%c3_28, %c0_29, %c0_30] : memref<4x4x32xf32, #tpu.memory_space<vmem>>, vector<1x4x32xf32>
    %49 = vector.shape_cast %48 : vector<1x4x32xf32> to vector<4x32xf32>
    %50 = arith.mulf %1, %47 : vector<4x32xf32>
    %51 = arith.mulf %3, %49 : vector<4x32xf32>
    %52 = arith.subf %50, %51 : vector<4x32xf32>
    %cst_31 = arith.constant dense<0.000000e+00> : vector<32xf32>
    %53 = vector.multi_reduction <add>, %52, %cst_31 [0] : vector<4x32xf32> to vector<32xf32>
    %54 = vector.shape_cast %53 : vector<32xf32> to vector<1x32xf32>
    %55 = arith.mulf %1, %49 : vector<4x32xf32>
    %56 = arith.mulf %3, %47 : vector<4x32xf32>
    %57 = arith.addf %55, %56 : vector<4x32xf32>
    %cst_32 = arith.constant dense<0.000000e+00> : vector<32xf32>
    %58 = vector.multi_reduction <add>, %57, %cst_32 [0] : vector<4x32xf32> to vector<32xf32>
    %59 = vector.shape_cast %58 : vector<32xf32> to vector<1x32xf32>
    %60 = tpu.concatenate %12, %26, %40, %54 in 0 : vector<1x32xf32>, vector<1x32xf32>, vector<1x32xf32>, vector<1x32xf32> -> vector<4x32xf32>
    %c0_33 = arith.constant 0 : index
    %c0_34 = arith.constant 0 : index
    %c0_35 = arith.constant 0 : index
    %61 = vector.load %arg5[%c0_33, %c0_34, %c0_35] : memref<1x4x32xf32, #tpu.memory_space<vmem>>, vector<1x4x32xf32>
    %62 = vector.shape_cast %61 : vector<1x4x32xf32> to vector<4x32xf32>
    %63 = vector.shape_cast %60 : vector<4x32xf32> to vector<1x4x32xf32>
    tpu.vector_store %arg5[%c0_33, %c0_34, %c0_35], %63 {strides = array<i32>} : memref<1x4x32xf32, #tpu.memory_space<vmem>>, vector<1x4x32xf32>,
    %64 = tpu.concatenate %17, %31, %45, %59 in 0 : vector<1x32xf32>, vector<1x32xf32>, vector<1x32xf32>, vector<1x32xf32> -> vector<4x32xf32>
    %c0_36 = arith.constant 0 : index
    %c0_37 = arith.constant 0 : index
    %c0_38 = arith.constant 0 : index
    %65 = vector.load %arg6[%c0_36, %c0_37, %c0_38] : memref<1x4x32xf32, #tpu.memory_space<vmem>>, vector<1x4x32xf32>
    %66 = vector.shape_cast %65 : vector<1x4x32xf32> to vector<4x32xf32>
    %67 = vector.shape_cast %64 : vector<4x32xf32> to vector<1x4x32xf32>
    tpu.vector_store %arg6[%c0_36, %c0_37, %c0_38], %67 {strides = array<i32>} : memref<1x4x32xf32, #tpu.memory_space<vmem>>, vector<1x4x32xf32>,
    return
  }
  func.func @transform_0(%arg0: i32) -> (i32, i32, i32) {
    %c0_i32 = arith.constant 0 : i32
    %c0_i32_0 = arith.constant 0 : i32
    %c0_i32_1 = arith.constant 0 : i32
    return %arg0, %c0_i32, %c0_i32_0 : i32, i32, i32
  }
  func.func @transform_1(%arg0: i32) -> (i32, i32, i32) {
    %c0_i32 = arith.constant 0 : i32
    %c0_i32_0 = arith.constant 0 : i32
    %c0_i32_1 = arith.constant 0 : i32
    return %arg0, %c0_i32, %c0_i32_0 : i32, i32, i32
  }
  func.func @transform_2(%arg0: i32) -> (i32, i32, i32) {
    %c0_i32 = arith.constant 0 : i32
    %c0_i32_0 = arith.constant 0 : i32
    %c0_i32_1 = arith.constant 0 : i32
    %c0_i32_2 = arith.constant 0 : i32
    return %c0_i32, %c0_i32_0, %c0_i32_1 : i32, i32, i32
  }
  func.func @transform_3(%arg0: i32) -> (i32, i32, i32) {
    %c0_i32 = arith.constant 0 : i32
    %c0_i32_0 = arith.constant 0 : i32
    %c0_i32_1 = arith.constant 0 : i32
    %c0_i32_2 = arith.constant 0 : i32
    return %c0_i32, %c0_i32_0, %c0_i32_1 : i32, i32, i32
  }
  func.func @transform_4(%arg0: i32) -> (i32, i32, i32) {
    %c0_i32 = arith.constant 0 : i32
    %c0_i32_0 = arith.constant 0 : i32
    %c0_i32_1 = arith.constant 0 : i32
    return %arg0, %c0_i32, %c0_i32_0 : i32, i32, i32
  }
  func.func @transform_5(%arg0: i32) -> (i32, i32, i32) {
    %c0_i32 = arith.constant 0 : i32
    %c0_i32_0 = arith.constant 0 : i32
    %c0_i32_1 = arith.constant 0 : i32
    return %arg0, %c0_i32, %c0_i32_0 : i32, i32, i32
  }
}

module attributes {stable_mosaic.version = 11 : i64} {
  func.func @_pointwise_add_kernel(%arg0: i32, %arg1: memref<4x5xf32, #tpu.memory_space<vmem>>, %arg2: memref<5x256xf32, #tpu.memory_space<vmem>>, %arg3: memref<4x256xf32, #tpu.memory_space<vmem>>, %arg4: memref<4x256xf32, #tpu.memory_space<vmem>>) attributes {dimension_semantics = [#tpu.dimension_semantics<parallel>], iteration_bounds = array<i64: 2>, scalar_prefetch = 0 : i64, scratch_operands = 0 : i64, tpu.core_type = #tpu.core_type<tc>, window_params = [{pipeline_mode = #tpu.pipeline_mode<synchronous>, transform_indices = @transform_0, window_bounds = array<i64: 4, 5>}, {transform_indices = @transform_1, window_bounds = array<i64: 5, 256>}, {transform_indices = @transform_2, window_bounds = array<i64: 4, 256>}, {transform_indices = @transform_3, window_bounds = array<i64: 4, 256>}]} {
    %c0 = arith.constant 0 : index
    %c0_0 = arith.constant 0 : index
    %0 = vector.load %arg1[%c0, %c0_0] : memref<4x5xf32, #tpu.memory_space<vmem>>, vector<4x5xf32>
    %c0_1 = arith.constant 0 : index
    %c0_2 = arith.constant 0 : index
    %1 = vector.load %arg2[%c0_1, %c0_2] : memref<5x256xf32, #tpu.memory_space<vmem>>, vector<5x256xf32>
    %cst = arith.constant dense<0.000000e+00> : vector<4x256xf32>
    %2 = tpu.matmul %0, %1, %cst {dimension_numbers = #tpu.dot_dimension_numbers<[1], [0], [0], [1], [0, 0, 1, 1], [], []>} : vector<4x5xf32>, vector<5x256xf32>, vector<4x256xf32> -> vector<4x256xf32>
    %c0_3 = arith.constant 0 : index
    %c0_4 = arith.constant 0 : index
    %3 = vector.load %arg3[%c0_3, %c0_4] : memref<4x256xf32, #tpu.memory_space<vmem>>, vector<4x256xf32>
    %4 = arith.addf %2, %3 : vector<4x256xf32>
    %c0_5 = arith.constant 0 : index
    %c0_6 = arith.constant 0 : index
    %5 = vector.load %arg4[%c0_5, %c0_6] : memref<4x256xf32, #tpu.memory_space<vmem>>, vector<4x256xf32>
    tpu.vector_store %arg4[%c0_5, %c0_6], %4 {strides = array<i32>} : memref<4x256xf32, #tpu.memory_space<vmem>>, vector<4x256xf32>,
    return
  }
  func.func @transform_0(%arg0: i32) -> (i32, i32) {
    %c0_i32 = arith.constant 0 : i32
    %c0_i32_0 = arith.constant 0 : i32
    %c0_i32_1 = arith.constant 0 : i32
    return %c0_i32, %c0_i32_0 : i32, i32
  }
  func.func @transform_1(%arg0: i32) -> (i32, i32) {
    %c0_i32 = arith.constant 0 : i32
    %c0_i32_0 = arith.constant 0 : i32
    return %c0_i32, %arg0 : i32, i32
  }
  func.func @transform_2(%arg0: i32) -> (i32, i32) {
    %c0_i32 = arith.constant 0 : i32
    %c0_i32_0 = arith.constant 0 : i32
    return %c0_i32, %arg0 : i32, i32
  }
  func.func @transform_3(%arg0: i32) -> (i32, i32) {
    %c0_i32 = arith.constant 0 : i32
    %c0_i32_0 = arith.constant 0 : i32
    return %c0_i32, %arg0 : i32, i32
  }
}

</mosaic_0001>

<bundles_post_ra>
// kernel: reverse.0
= control target key start
LH: loop header
LB: loop body
LE: loop exit
PB: predicated region body
PF: predicated region fallthrough
CT: control target
= control target key end

     0   :  { %v71_v3 = vlaneseq  ;;  %v64_v9 = vld [vmem:[#allocation0 + $0x7] ss:$-1 sm:$0xff]  ;;  %v78_v12 = vld [vmem:[#allocation0 + $0x17] ss:$-1 sm:$0xff]  ;;  %s329_s0 = inlined_call_operand.vmem [shape: f32[2,4,16,7], index: 0, kind: input, shape index: {}]   ;;  %s330_s1 = inlined_call_operand.vmem [shape: f32[2,4,16,7], index: 1, kind: output, shape index: {}]  }
   0x1   :  { %v44_v0 = vld [vmem:[%s329_s0] sm:$0xff]  ;;  %v46_v1 = vld [vmem:[%s329_s0 + $0x8] sm:$0xff]  ;;  %v48_v2 = vld [vmem:[%s329_s0 + $0x10] sm:$0xff]  ;;  %v65_v10 = vrot.slane %v64_v9, 1  ;;  %v79_v14 = vrot.slane %v78_v12, 1 }
   0x2   :  { %45 = vst [vmem:[#allocation0 + $0x8] sm:$0xff] %v44_v0  ;;  %47 = vst [vmem:[#allocation0 + $0x18] sm:$0xff] %v46_v1  ;;  %v50_v4 = vld [vmem:[%s329_s0 + $0x18] sm:$0xff]  ;;  %v52_v5 = vld [vmem:[%s329_s0 + $0x20] sm:$0xff]  ;;  %v72_v11 = vshrl.u32 %v71_v3, 7 }
   0x3   :  { %49 = vst [vmem:[#allocation0 + $0x28] sm:$0xff] %v48_v2  ;;  %v54_v6 = vld [vmem:[%s329_s0 + $0x28] sm:$0xff]  ;;  %51 = vst [vmem:[#allocation0 + $0x38] sm:$0xff] %v50_v4  ;;  %v56_v7 = vld [vmem:[%s329_s0 + $0x30] sm:$0xff] }
   0x4   :  { %53 = vst [vmem:[#allocation0 + $0x48] sm:$0xff] %v52_v5  ;;  %55 = vst [vmem:[#allocation0 + $0x58] sm:$0xff] %v54_v6  ;;  %v58_v8 = vld [vmem:[%s329_s0 + $0x38] sm:$0xff]  ;;  %v92_v13 = vld [vmem:[#allocation0 + $0x27] ss:$-1 sm:$0xff]  ;;  %vm73_vm0 = vcmp.lt.s32.totalorder %v72_v11, 7 }
   0x5   :  { %57 = vst [vmem:[#allocation0 + $0x68] sm:$0xff] %v56_v7  ;;  %59 = vst [vmem:[#allocation0 + $0x78] sm:$0xff] %v58_v8  ;;  %v93_v15 = vrot.slane %v92_v13, 1  ;;  %v106_v16 = vld [vmem:[#allocation0 + $0x37] ss:$-1 sm:$0xff] }
   0x6   :  { %66 = vst [vmem:[#allocation1] sm:$0xff] %v65_v10  ;;  %v107_v17 = vrot.slane %v106_v16, 1  ;;  %v120_v18 = vld [vmem:[#allocation0 + $0x47] ss:$-1 sm:$0xff]  ;;  %v134_v19 = vld [vmem:[#allocation0 + $0x57] ss:$-1 sm:$0xff] }
   0x7   :  { %80 = vst [vmem:[#allocation1 + $0x8] sm:$0xff] %v79_v14  ;;  %94 = vst [vmem:[#allocation1 + $0x10] sm:$0xff] %v93_v15  ;;  %v121_v20 = vrot.slane %v120_v18, 1  ;;  %v135_v21 = vrot.slane %v134_v19, 1  ;;  %v148_v22 = vld [vmem:[#allocation0 + $0x67] ss:$-1 sm:$0xff] }
   0x8   :  { %v162_v23 = vld [vmem:[#allocation0 + $0x77] ss:$-1 sm:$0xff]  ;;  %108 = vst [vmem:[#allocation1 + $0x18] sm:$0xff] %v107_v17  ;;  %v149_v24 = vrot.slane %v148_v22, 1 }
   0x9   :  { %v163_v25 = vrot.slane %v162_v23, 1  ;;  %v69_v26 = vld [vmem:[#allocation0 + $0xf] ss:$-1 sm:$0xff]  ;;  %v83_v27 = vld [vmem:[#allocation0 + $0x1f] ss:$-1 sm:$0xff]  ;;  %122 = vst [vmem:[#allocation1 + $0x20] sm:$0xff] %v121_v20 }
   0xa   :  { %v97_v28 = vld [vmem:[#allocation0 + $0x2f] ss:$-1 sm:$0xff]  ;;  %136 = vst [vmem:[#allocation1 + $0x28] sm:$0xff] %v135_v21  ;;  %v70_v29 = vrot.slane %v69_v26, 1  ;;  %v84_v30 = vrot.slane %v83_v27, 1  ;;  %150 = vst [vmem:[#allocation1 + $0x30] sm:$0xff] %v149_v24 }
   0xb   :  { %v98_v31 = vrot.slane %v97_v28, 1  ;;  %v111_v32 = vld [vmem:[#allocation0 + $0x3f] ss:$-1 sm:$0xff]  ;;  %164 = vst [vmem:[#allocation1 + $0x38] sm:$0xff] %v163_v25  ;;  %v125_v34 = vld [vmem:[#allocation0 + $0x4f] ss:$-1 sm:$0xff] }
   0xc   :  { %v112_v33 = vrot.slane %v111_v32, 1  ;;  %v139_v35 = vld [vmem:[#allocation0 + $0x5f] ss:$-1 sm:$0xff]  ;;  %74 = vst.msk [vmem:[#allocation1] sm:$0xff] %vm73_vm0, %v70_v29  ;;  %88 = vst.msk [vmem:[#allocation1 + $0x8] sm:$0xff] %vm73_vm0, %v84_v30  ;;  %v126_v36 = vrot.slane %v125_v34, 1 }
   0xd   :  { %102 = vst.msk [vmem:[#allocation1 + $0x10] sm:$0xff] %vm73_vm0, %v98_v31  ;;  %v140_v37 = vrot.slane %v139_v35, 1  ;;  %v153_v38 = vld [vmem:[#allocation0 + $0x6f] ss:$-1 sm:$0xff]  ;;  %v167_v39 = vld [vmem:[#allocation0 + $0x7f] ss:$-1 sm:$0xff] }
   0xe   :  { %116 = vst.msk [vmem:[#allocation1 + $0x18] sm:$0xff] %vm73_vm0, %v112_v33  ;;  %v154_v40 = vrot.slane %v153_v38, 1  ;;  %v168_v41 = vrot.slane %v167_v39, 1  ;;  %130 = vst.msk [vmem:[#allocation1 + $0x20] sm:$0xff] %vm73_vm0, %v126_v36 }
   0xf   :  { %144 = vst.msk [vmem:[#allocation1 + $0x28] sm:$0xff] %vm73_vm0, %v140_v37 }
  0x10   :  { %158 = vst.msk [vmem:[#allocation1 + $0x30] sm:$0xff] %vm73_vm0, %v154_v40  ;;  %172 = vst.msk [vmem:[#allocation1 + $0x38] sm:$0xff] %vm73_vm0, %v168_v41 }
  0x13   :  { %v214_v42 = vld [vmem:[#allocation1] sm:$0xff]  ;;  %v216_v43 = vld [vmem:[#allocation1 + $0x8] sm:$0xff] }
  0x14   :  { %v218_v44 = vld [vmem:[#allocation1 + $0x10] sm:$0xff]  ;;  %215 = vst [vmem:[%s330_s1] sm:$0xff] %v214_v42  ;;  %217 = vst [vmem:[%s330_s1 + $0x8] sm:$0xff] %v216_v43 }
  0x15   :  { %219 = vst [vmem:[%s330_s1 + $0x10] sm:$0xff] %v218_v44  ;;  %v220_v45 = vld [vmem:[#allocation1 + $0x18] sm:$0xff]  ;;  %v222_v46 = vld [vmem:[#allocation1 + $0x20] sm:$0xff] }
  0x16   :  { %221 = vst [vmem:[%s330_s1 + $0x18] sm:$0xff] %v220_v45  ;;  %v224_v47 = vld [vmem:[#allocation1 + $0x28] sm:$0xff]  ;;  %223 = vst [vmem:[%s330_s1 + $0x20] sm:$0xff] %v222_v46 }
  0x17   :  { %225 = vst [vmem:[%s330_s1 + $0x28] sm:$0xff] %v224_v47  ;;  %v226_v48 = vld [vmem:[#allocation1 + $0x30] sm:$0xff]  ;;  %v228_v49 = vld [vmem:[#allocation1 + $0x38] sm:$0xff] }
  0x18   :  { %227 = vst [vmem:[%s330_s1 + $0x30] sm:$0xff] %v226_v48  ;;  %229 = vst [vmem:[%s330_s1 + $0x38] sm:$0xff] %v228_v49 }

// kernel: block_forward.2
= control target key start
LH: loop header
LB: loop body
LE: loop exit
PB: predicated region body
PF: predicated region fallthrough
CT: control target
= control target key end

     0   :  { %s515_s18 = smov 0   ;;  %s584_s0 = inlined_call_operand.vmem [shape: f32[2,4,32], index: 0, kind: input, shape index: {}]   ;;  %s585_s1 = inlined_call_operand.vmem [shape: f32[2,4,32], index: 1, kind: input, shape index: {}]   ;;  %s586_s2 = inlined_call_operand.vmem [shape: f32[4,4,32], index: 2, kind: input, shape index: {}]   ;;  %s587_s3 = inlined_call_operand.vmem [shape: f32[4,4,32], index: 3, kind: input, shape index: {}]   ;;  %s588_s4 = inlined_call_operand.vmem [shape: f32[2,4,32], index: 4, kind: output, shape index: {0}]   ;;  %s589_s5 = inlined_call_operand.vmem [shape: f32[2,4,32], index: 5, kind: output, shape index: {1}]  }
   0x1 LB: > { %s452_s19 = sadd.s32 4294967295, %s483_s18   ;;  %p456_p0 = scmp.ge.s32.totalorder %s483_s18, 1  ;;  %s483_s18 = sphi %s515_s18, %s16_s18  }
   0x2   : > { %p198_p1 = scmp.lt.s32.totalorder %s483_s18, 3 }
   0x4   : > { %p199_p2 = pnand %p456_p0, %p198_p1 }
   0x5   : > { %p232_p3 = scmp.lt.s32.totalorder (!%p199_p2), %s452_s19, 1  ;;  %v250_v0 = vld [vmem:[%s586_s2] sm:$0xf] (!%p199_p2)  ;;  %v461_v2 = vld [vmem:[%s586_s2 + $0x4] sm:$0xf] (!%p199_p2)  ;;  %vm255_vm0 = vcmask (!%p199_p2), 257024  }
   0x6   : > { %202 = sbr.rel (%p199_p2) target bundleno = 46 (0x2e), region = 36  ;;  %v251_v1 = vld [vmem:[%s587_s3] sm:$0xf] (!%p199_p2)  ;;  %v462_v3 = vld [vmem:[%s587_s3 + $0x4] sm:$0xf] (!%p199_p2)  ;;  %vm345_vm1 = vcmask (!%p199_p2), 1040384  }
   0x7   : > { %v463_v4 = vld [vmem:[%s586_s2 + $0x8] sm:$0xf] (!%p199_p2)  ;;  %v465_v6 = vld [vmem:[%s586_s2 + $0xc] sm:$0xf] (!%p199_p2)  ;;  %vm347_vm2 = vcmask (!%p199_p2), 1041408   ;;  %vm349_vm3 = vcmask (!%p199_p2), 1042432  }
   0x8   : > { %v464_v5 = vld [vmem:[%s587_s3 + $0x8] sm:$0xf] (!%p199_p2)  ;;  %v466_v7 = vld [vmem:[%s587_s3 + $0xc] sm:$0xf] (!%p199_p2) }
   0xd   : > { %s591_s19 = smov (!%p232_p3, %s452_s19), 1 }
   0xe   : > { %s532_s26 = sshll.u32 %s591_s19, 2 }
   0xf   : > { %s235_s8 = scalar_lea.vmem %s584_s0, %s532_s26  ;;  %s239_s11 = scalar_lea.vmem %s585_s1, %s532_s26 }
  0x10   : > { %v248_v8 = vld [vmem:[%s235_s8] sm:$0xf]  ;;  %s243_s21 = scalar_lea.vmem %s588_s4, %s532_s26  ;;  %s247_s24 = scalar_lea.vmem %s589_s5, %s532_s26 }
  0x11   : > { %v249_v9 = vld [vmem:[%s239_s11] sm:$0xf]  ;;  %v252_v10 = vmul.f32 %v250_v0, %v248_v8  ;;  %v277_v12 = vmul.f32 %v461_v2, %v248_v8  ;;  %v301_v14 = vmul.f32 %v463_v4, %v248_v8  ;;  %v325_v16 = vmul.f32 %v465_v6, %v248_v8 }
  0x12   : > { %v253_v11 = vmul.f32 %v251_v1, %v249_v9  ;;  %v278_v13 = vmul.f32 %v462_v3, %v249_v9  ;;  %v302_v15 = vmul.f32 %v464_v5, %v249_v9  ;;  %v326_v17 = vmul.f32 %v466_v7, %v249_v9 }
  0x13   : > { %v263_v20 = vmul.f32 %v251_v1, %v248_v8  ;;  %v264_v21 = vmul.f32 %v250_v0, %v249_v9  ;;  %v287_v24 = vmul.f32 %v462_v3, %v248_v8  ;;  %v288_v25 = vmul.f32 %v461_v2, %v249_v9 }
  0x14   : > { %v254_v18 = vsub.f32 %v252_v10, %v253_v11  ;;  %v279_v19 = vsub.f32 %v277_v12, %v278_v13  ;;  %v303_v22 = vsub.f32 %v301_v14, %v302_v15  ;;  %v327_v23 = vsub.f32 %v325_v16, %v326_v17 }
  0x15   : > { %v265_v28 = vadd.f32 %v264_v21, %v263_v20  ;;  %v311_v29 = vmul.f32 %v464_v5, %v248_v8  ;;  %v289_v37 = vadd.f32 %v288_v25, %v287_v24  ;;  %v312_v41 = vmul.f32 %v463_v4, %v249_v9 }
  0x16   : > { %v256_v26 = vsel %vm255_vm0, %v254_v18, 0.0  ;;  %v280_v27 = vsel %vm255_vm0, %v279_v19, 0.0  ;;  %v304_v32 = vsel %vm255_vm0, %v303_v22, 0.0  ;;  %v328_v33 = vsel %vm255_vm0, %v327_v23, 0.0 }
  0x17   : > { %v257_v30 = vrot.slane %v256_v26, 4  ;;  %v281_v31 = vrot.slane %v280_v27, 4  ;;  %v305_v34 = vrot.slane %v304_v32, 4  ;;  %v329_v35 = vrot.slane %v328_v33, 4 }
  0x18   : > { %v266_v36 = vsel %vm255_vm0, %v265_v28, 0.0  ;;  %v290_v44 = vsel %vm255_vm0, %v289_v37, 0.0  ;;  %v335_v45 = vmul.f32 %v466_v7, %v248_v8  ;;  %v313_v52 = vadd.f32 %v312_v41, %v311_v29 }
  0x19   : > { %v258_v38 = vadd.f32 %v257_v30, %v256_v26  ;;  %v282_v39 = vadd.f32 %v281_v31, %v280_v27  ;;  %v267_v40 = vrot.slane %v266_v36, 4  ;;  %v306_v42 = vadd.f32 %v305_v34, %v304_v32 }
  0x1a   : > { %v330_v43 = vadd.f32 %v329_v35, %v328_v33  ;;  %v291_v49 = vrot.slane %v290_v44, 4  ;;  %v336_v53 = vmul.f32 %v465_v6, %v249_v9  ;;  %v314_v60 = vsel %vm255_vm0, %v313_v52, 0.0 }
  0x1b   : > { %v259_v46 = vrot.slane %v258_v38, 2  ;;  %v283_v47 = vrot.slane %v282_v39, 2  ;;  %v268_v48 = vadd.f32 %v267_v40, %v266_v36  ;;  %v307_v50 = vrot.slane %v306_v42, 2 }
  0x1c   : > { %v331_v51 = vrot.slane %v330_v43, 2  ;;  %v292_v57 = vadd.f32 %v291_v49, %v290_v44  ;;  %v337_v61 = vadd.f32 %v336_v53, %v335_v45  ;;  %v315_v4 = vrot.slane %v314_v60, 4 }
  0x1d   : > { %v260_v54 = vadd.f32 %v259_v46, %v258_v38  ;;  %v284_v55 = vadd.f32 %v283_v47, %v282_v39  ;;  %v269_v56 = vrot.slane %v268_v48, 2  ;;  %v308_v58 = vadd.f32 %v307_v50, %v306_v42 }
  0x1e   : > { %v332_v59 = vadd.f32 %v331_v51, %v330_v43  ;;  %v293_v1 = vrot.slane %v292_v57, 2  ;;  %v338_v5 = vsel %vm255_vm0, %v337_v61, 0.0  ;;  %v316_v12 = vadd.f32 %v315_v4, %v314_v60 }
  0x1f   : > { %v261_v62 = vrot.slane %v260_v54, 1  ;;  %v285_v63 = vrot.slane %v284_v55, 1  ;;  %v270_v0 = vadd.f32 %v269_v56, %v268_v48  ;;  %v309_v2 = vrot.slane %v308_v58, 1 }
  0x20   : > { %v333_v3 = vrot.slane %v332_v59, 1  ;;  %v294_v9 = vadd.f32 %v293_v1, %v292_v57  ;;  %v339_v13 = vrot.slane %v338_v5, 4  ;;  %v317_v17 = vrot.slane %v316_v12, 2 }
  0x21   : > { %v262_v6 = vadd.f32 %v261_v62, %v260_v54  ;;  %v286_v7 = vadd.f32 %v285_v63, %v284_v55  ;;  %v271_v8 = vrot.slane %v270_v0, 1  ;;  %v310_v10 = vadd.f32 %v309_v2, %v308_v58 }
  0x22   : > { %v334_v11 = vadd.f32 %v333_v3, %v332_v59  ;;  %v295_v15 = vrot.slane %v294_v9, 1  ;;  %v340_v18 = vadd.f32 %v339_v13, %v338_v5  ;;  %v318_v22 = vadd.f32 %v317_v17, %v316_v12 }
  0x23   : > { %v346_v14 = vsel %vm345_vm1, %v262_v6, %v286_v7  ;;  %v272_v20 = vadd.f32 %v271_v8, %v270_v0 }
  0x24   : > { %v348_v16 = vsel %vm347_vm2, %v346_v14, %v310_v10  ;;  %v296_v21 = vadd.f32 %v295_v15, %v294_v9  ;;  %v341_v23 = vrot.slane %v340_v18, 2  ;;  %v319_v24 = vrot.slane %v318_v22, 1 }
  0x25   : > { %v350_v19 = vsel %vm349_vm3, %v348_v16, %v334_v11 }
  0x26   : > { %351 = vst.msk [vmem:[%s243_s21] sm:$0xf] %vm255_vm0, %v350_v19  ;;  %v342_v25 = vadd.f32 %v341_v23, %v340_v18  ;;  %v352_v26 = vsel %vm345_vm1, %v272_v20, %v296_v21  ;;  %v320_v27 = vadd.f32 %v319_v24, %v318_v22 }
  0x28   : > { %v343_v28 = vrot.slane %v342_v25, 1  ;;  %v353_v30 = vsel %vm347_vm2, %v352_v26, %v320_v27 }
  0x2a   : > { %v344_v29 = vadd.f32 %v343_v28, %v342_v25 }
  0x2c   : > { %v354_v31 = vsel %vm349_vm3, %v353_v30, %v344_v29 }
  0x2d   : > { %355 = vst.msk [vmem:[%s247_s24] sm:$0xf] %vm255_vm0, %v354_v31 }
  0x2e PF: > { %s16_s18 = sadd.s32 1, %s483_s18  }
  0x2f   : > { %p13_p4 = scmp.ge.s32.totalorder %s16_s18, 4  }
  0x31   :  { %15 = sbr.rel (!%p13_p4) target bundleno = 1 (0x1), region = 87 }

// kernel: block_forward.3
= control target key start
LH: loop header
LB: loop body
LE: loop exit
PB: predicated region body
PF: predicated region fallthrough
CT: control target
= control target key end

     0   :  { %s413_s12 = smov 0   ;;  %s436_s0 = inlined_call_operand.vmem [shape: f32[4,5], index: 0, kind: input, shape index: {}]   ;;  %s437_s1 = inlined_call_operand.vmem [shape: f32[5,512], index: 1, kind: input, shape index: {}]   ;;  %s438_s2 = inlined_call_operand.vmem [shape: f32[4,512], index: 2, kind: input, shape index: {}]   ;;  %s439_s3 = inlined_call_operand.vmem [shape: f32[4,512], index: 3, kind: output, shape index: {}]  }
   0x1 LB: > { %s358_s13 = sadd.s32 4294967295, %s390_s12   ;;  %p362_p0 = scmp.ge.s32.totalorder %s390_s12, 1  ;;  %s390_s12 = sphi %s413_s12, %s13_s12  }
   0x2   : > { %p149_p1 = scmp.lt.s32.totalorder %s390_s12, 3 }
   0x4   : > { %p150_p2 = pnand %p362_p0, %p149_p1 }
   0x5   : > { %s363_s14 = sshll.u32 (!%p150_p2), %s358_s13, 1  ;;  %v392_v0 = vmov (!%p150_p2), 0.0   ;;  %vm207_vm0 = vcmask (!%p150_p2), 1044480   ;;  %v196_v1 = vld [vmem:[%s436_s0] sm:$0xf] (!%p150_p2)  ;;  %vm203_vm1 = vcmask (!%p150_p2), 39936  }
   0x6   : > { %153 = sbr.rel (%p150_p2) target bundleno = 237 (0xed), region = 32  ;;  %p179_p3 = scmp.lt.s32.totalorder (!%p150_p2), %s363_s14, 3  ;;  %278 = vmatprep.mubr.f32.mxu0 (!%p150_p2), %v392_v0 }
   0xd   : > { %s441_s14 = smov (!%p179_p3, %s363_s14), 3 }
   0xe   : > { %s364_s15 = sshll.u32 %s441_s14, 3  ;;  %s366_s21 = sshll.u32 %s441_s14, 2 }
   0xf   : > { %s182_s18 = scalar_lea.vmem %s437_s1, %s364_s15  ;;  %s188_s24 = scalar_lea.vmem %s438_s2, %s366_s21 }
  0x10   : > { %v198_v2 = vld [vmem:[%s182_s18 + $0x8] sm:$0x1f]  ;;  %v197_v3 = vld [vmem:[%s182_s18] sm:$0x1f]  ;;  %s194_s27 = scalar_lea.vmem %s439_s3, %s366_s21 }
  0x11   : > { %369 = vmatprep.subr.msk.mxu0 %vm207_vm0, %v198_v2  ;;  %v199_v4 = vld [vmem:[%s188_s24] sm:$0xff] }
  0x12   : > { %370 = vmatpush1.msk.msra.mxu0 %vm207_vm0, %v197_v3  ;;  %v201_v5 = vcombine.high %v199_v4, %v199_v4 }
  0x13   : > { %371 = vmatmul.mubr.msk.f32.vlgmr.msra.gmra.mrb[0].mxu0 %vm203_vm1, %v196_v1 }
  0xe6   : > { %v280_v6 = vpop.f32.mrb[0].mxu0 }
  0xe7   : > { %v281_v7 = vadd.f32 %v280_v6, %v199_v4  ;;  %v282_v8 = vpop.f32.mrb[1].mxu0 }
  0xe8   : > { %v283_v9 = vadd.f32 %v282_v8, %v201_v5 }
  0xea   : > { %v287_v10 = vcombine.low %v281_v7, %v283_v9 }
  0xec   : > { %289 = vst [vmem:[%s194_s27] sm:$0xff] %v287_v10 }
  0xed PF: > { %s13_s12 = sadd.s32 1, %s390_s12  }
  0xee   : > { %p10_p4 = scmp.ge.s32.totalorder %s13_s12, 4  }
  0xf0   :  { %12 = sbr.rel (!%p10_p4) target bundleno = 1 (0x1), region = 65 }

</bundles_post_ra>
